<compile_context>
chip_gen: v7x
topology: tpu7x:2x2x1
jax: 0.10.0
libtpu: 0.0.40
codegen_flags: <defaults>
</compile_context>

<pallas_src>
from functools import partial

import jax
import jax.numpy as jnp
from jax.experimental import pallas as pl
from jax.experimental.pallas import tpu as pltpu

HIDDEN = 512


def mlp_kernel(x_ref, w1_ref, b1_ref, w2_ref, b2_ref, o_ref, *,
               compute_dtype, act_dtype):
    # In-kernel cast of the x tile (no-op when compute_dtype == x dtype).
    x = x_ref[...].astype(compute_dtype)
    # Layer 1: (TB, D_in) @ (D_in, 512) -> f32 accumulate, bias, tanh.
    acc1 = jnp.dot(x, w1_ref[...], preferred_element_type=jnp.float32)
    h = jnp.tanh((acc1 + b1_ref[...]).astype(act_dtype))
    # Layer 2: (TB, 512) @ (512, D_out) -> f32 accumulate, bias, tanh.
    acc2 = jnp.dot(h.astype(w2_ref.dtype), w2_ref[...],
                   preferred_element_type=jnp.float32)
    o = jnp.tanh((acc2 + b2_ref[...]).astype(act_dtype))
    o_ref[...] = o.astype(o_ref.dtype)


def _default_act_dtype():
    """bf16 tanh on v6e/v7x (bf16 EUP/VPU); f32 on v5e (no bf16 vector units)."""
    try:
        kind = jax.devices()[0].device_kind.lower()
    except Exception:
        return jnp.bfloat16
    return jnp.float32 if "v5" in kind else jnp.bfloat16


def _vmem_capacity_bytes():
    """Per-core VMEM capacity; conservative 64 MiB (v7x) fallback."""
    try:
        info = pltpu.get_tpu_info()
        cap = getattr(info, "vmem_capacity_bytes", None)
        if cap:
            return int(cap)
    except Exception:
        pass
    return 64 << 20


def _choose_tile_b(B, fits):
    """Largest batch tile (multiple of 8, <= 512) that fits the VMEM budget.
    Prefers 256+ to fill the MXU M dimension and amortize per-step overhead."""
    b8 = 8 * pl.cdiv(B, 8)
    candidates = sorted({512, 256, 128, 64, 32, 16, 8}
                        | ({b8} if b8 <= 512 else set()), reverse=True)
    for t in candidates:
        if t <= b8 and t % 8 == 0 and fits(t):
            return t
    return 8


def prepare_params(w1, b1, w2, b2, compute_dtype=jnp.bfloat16):
    """One-time weight conversion (cache these; avoids per-call HBM cast passes)."""
    return (w1.astype(compute_dtype), b1.astype(jnp.float32),
            w2.astype(compute_dtype), b2.astype(jnp.float32))


def nonlinear_regression_forward(x, w1, b1, w2, b2, *, tile_b=None,
                                 compute_dtype=jnp.bfloat16, act_dtype=None):
    """x: (B, D_in); w1: (D_in, 512); b1: (512,); w2: (512, D_out); b2: (D_out,)."""
    B, d_in = x.shape
    d_out = w2.shape[1]
    assert w1.shape == (d_in, HIDDEN) and w2.shape[0] == HIDDEN
    if act_dtype is None:
        act_dtype = _default_act_dtype()

    # No-ops when prepare_params() was used; otherwise cast here.
    w1 = w1 if w1.dtype == compute_dtype else w1.astype(compute_dtype)
    w2 = w2 if w2.dtype == compute_dtype else w2.astype(compute_dtype)
    b1_2d = b1.reshape(1, HIDDEN).astype(jnp.float32)
    b2_2d = b2.reshape(1, d_out).astype(jnp.float32)

    w_isz = jnp.dtype(compute_dtype).itemsize
    a_isz = jnp.dtype(act_dtype).itemsize
    x_isz = x.dtype.itemsize
    o_isz = x.dtype.itemsize
    f32 = 4

    def tile_vmem(tb):
        n = 2 * tb * d_in * x_isz                 # x tile (double-buffered)
        n += 2 * tb * d_out * o_isz               # out tile (double-buffered)
        n += 2 * d_in * HIDDEN * w_isz            # w1 (resident, default 2x buf)
        n += 2 * HIDDEN * d_out * w_isz           # w2
        n += 2 * (HIDDEN + d_out) * f32           # biases
        n += tb * d_in * w_isz                    # in-kernel x cast
        n += tb * HIDDEN * (f32 + a_isz + w_isz)  # acc1, h, h cast for 2nd dot
        n += tb * d_out * (f32 + a_isz)           # acc2, o before store cast
        return n

    # ~75% of physical VMEM (=> ~48 MiB on v7x, ~96 MiB on v5e/v6e), capped.
    budget = min(_vmem_capacity_bytes() * 3 // 4, 100 << 20)

    if tile_b is None:
        tile_b = _choose_tile_b(B, lambda tb: tile_vmem(tb) <= budget)
    assert tile_b % 8 == 0, "tile_b must be a multiple of 8"

    # Pad ragged batches up to the tile granularity; slice rows off at the end.
    B_pad = tile_b * pl.cdiv(B, tile_b)
    if B_pad != B:
        x = jnp.pad(x, ((0, B_pad - B), (0, 0)))

    grid = (B_pad // tile_b,)
    vmem_limit = int(min(budget, max(tile_vmem(tile_b) + (2 << 20), 32 << 20)))

    cost = pl.CostEstimate(
        flops=2 * B_pad * HIDDEN * (d_in + d_out),
        transcendentals=B_pad * (HIDDEN + d_out),
        bytes_accessed=(B_pad * d_in * x_isz + d_in * HIDDEN * w_isz
                        + HIDDEN * d_out * w_isz + (HIDDEN + d_out) * f32
                        + B_pad * d_out * o_isz),
    )

    out = pl.pallas_call(
        partial(mlp_kernel, compute_dtype=compute_dtype, act_dtype=act_dtype),
        out_shape=jax.ShapeDtypeStruct((B_pad, d_out), x.dtype),
        grid=grid,
        in_specs=[
            pl.BlockSpec((tile_b, d_in), lambda i: (i, 0)),    # x tile
            pl.BlockSpec((d_in, HIDDEN), lambda i: (0, 0)),    # w1 (resident)
            pl.BlockSpec((1, HIDDEN), lambda i: (0, 0)),       # b1
            pl.BlockSpec((HIDDEN, d_out), lambda i: (0, 0)),   # w2 (resident)
            pl.BlockSpec((1, d_out), lambda i: (0, 0)),        # b2
        ],
        out_specs=pl.BlockSpec((tile_b, d_out), lambda i: (i, 0)),
        compiler_params=pltpu.CompilerParams(
            dimension_semantics=("parallel",),
            vmem_limit_bytes=vmem_limit,
        ),
        cost_estimate=cost,
    )(x, w1, b1_2d, w2, b2_2d)

    return out if B_pad == B else out[:B]


def init_params(key, input_dim, output_dim):
    """Deterministic synthetic init (PyTorch-style uniform fan-in bounds)."""
    k1, k2, k3, k4 = jax.random.split(key, 4)
    bound1 = 1.0 / (input_dim ** 0.5)
    bound2 = 1.0 / (HIDDEN ** 0.5)
    # Stored already transposed relative to PyTorch's (out, in) layout.
    w1 = jax.random.uniform(k1, (input_dim, HIDDEN), jnp.float32, -bound1, bound1)
    b1 = jax.random.uniform(k2, (HIDDEN,), jnp.float32, -bound1, bound1)
    w2 = jax.random.uniform(k3, (HIDDEN, output_dim), jnp.float32, -bound2, bound2)
    b2 = jax.random.uniform(k4, (output_dim,), jnp.float32, -bound2, bound2)
    return w1, b1, w2, b2


if __name__ == "__main__":
    key = jax.random.PRNGKey(0)
    input_dim, output_dim, batch = 32, 16, 8

    kx, kp = jax.random.split(key)
    x = jax.random.normal(kx, (batch, input_dim), jnp.float32)
    w1, b1, w2, b2 = init_params(kp, input_dim, output_dim)

    # One-time bf16 weight conversion (cached outside the forward).
    w1_c, b1_c, w2_c, b2_c = prepare_params(w1, b1, w2, b2)

    out = nonlinear_regression_forward(x, w1_c, b1_c, w2_c, b2_c)
    out = jax.block_until_ready(out)

    # Pure-JAX f32 reference; bf16 matmul operands / bf16 tanh stay well within
    # a few e-3 of it for this tanh-bounded MLP.
    ref = jnp.tanh(jnp.tanh(x @ w1 + b1) @ w2 + b2)
    assert out.shape == (batch, output_dim)
    assert jnp.allclose(out, ref, atol=3e-2, rtol=3e-2), "mismatch vs reference"

    print("KERNEL_OK")
</pallas_src>

<mosaic_0001>
module attributes {stable_mosaic.version = 11 : i64} {
  func.func @mlp_kernel(%arg0: i32, %arg1: memref<8x32xf32, #tpu.memory_space<vmem>>, %arg2: memref<32x512xbf16, #tpu.memory_space<vmem>>, %arg3: memref<1x512xf32, #tpu.memory_space<vmem>>, %arg4: memref<512x16xbf16, #tpu.memory_space<vmem>>, %arg5: memref<1x16xf32, #tpu.memory_space<vmem>>, %arg6: memref<8x16xf32, #tpu.memory_space<vmem>>) attributes {dimension_semantics = [#tpu.dimension_semantics<parallel>], iteration_bounds = array<i64: 1>, scalar_prefetch = 0 : i64, scratch_operands = 0 : i64, tpu.core_type = #tpu.core_type<tc>, window_params = [{transform_indices = @transform_0, window_bounds = array<i64: 8, 32>}, {pipeline_mode = #tpu.pipeline_mode<synchronous>, transform_indices = @transform_1, window_bounds = array<i64: 32, 512>}, {pipeline_mode = #tpu.pipeline_mode<synchronous>, transform_indices = @transform_2, window_bounds = array<i64: 1, 512>}, {pipeline_mode = #tpu.pipeline_mode<synchronous>, transform_indices = @transform_3, window_bounds = array<i64: 512, 16>}, {pipeline_mode = #tpu.pipeline_mode<synchronous>, transform_indices = @transform_4, window_bounds = array<i64: 1, 16>}, {transform_indices = @transform_5, window_bounds = array<i64: 8, 16>}]} {
    %c0 = arith.constant 0 : index
    %c0_0 = arith.constant 0 : index
    %0 = vector.load %arg1[%c0, %c0_0] : memref<8x32xf32, #tpu.memory_space<vmem>>, vector<8x32xf32>
    %1 = arith.truncf %0 : vector<8x32xf32> to vector<8x32xbf16>
    %c0_1 = arith.constant 0 : index
    %c0_2 = arith.constant 0 : index
    %2 = vector.load %arg2[%c0_1, %c0_2] : memref<32x512xbf16, #tpu.memory_space<vmem>>, vector<32x512xbf16>
    %cst = arith.constant dense<0.000000e+00> : vector<8x512xf32>
    %3 = tpu.matmul %1, %2, %cst {dimension_numbers = #tpu.dot_dimension_numbers<[1], [0], [0], [1], [0, 0, 1, 1], [], []>} : vector<8x32xbf16>, vector<32x512xbf16>, vector<8x512xf32> -> vector<8x512xf32>
    %c0_3 = arith.constant 0 : index
    %c0_4 = arith.constant 0 : index
    %4 = vector.load %arg3[%c0_3, %c0_4] : memref<1x512xf32, #tpu.memory_space<vmem>>, vector<1x512xf32>
    %5 = vector.broadcast %4 : vector<1x512xf32> to vector<8x512xf32>
    %6 = arith.addf %3, %5 : vector<8x512xf32>
    %7 = arith.truncf %6 : vector<8x512xf32> to vector<8x512xbf16>
    %8 = math.tanh %7 : vector<8x512xbf16>
    %c0_5 = arith.constant 0 : index
    %c0_6 = arith.constant 0 : index
    %9 = vector.load %arg4[%c0_5, %c0_6] : memref<512x16xbf16, #tpu.memory_space<vmem>>, vector<512x16xbf16>
    %cst_7 = arith.constant dense<0.000000e+00> : vector<8x16xf32>
    %10 = tpu.matmul %8, %9, %cst_7 {dimension_numbers = #tpu.dot_dimension_numbers<[1], [0], [0], [1], [0, 0, 1, 1], [], []>} : vector<8x512xbf16>, vector<512x16xbf16>, vector<8x16xf32> -> vector<8x16xf32>
    %c0_8 = arith.constant 0 : index
    %c0_9 = arith.constant 0 : index
    %11 = vector.load %arg5[%c0_8, %c0_9] : memref<1x16xf32, #tpu.memory_space<vmem>>, vector<1x16xf32>
    %12 = vector.broadcast %11 : vector<1x16xf32> to vector<8x16xf32>
    %13 = arith.addf %10, %12 : vector<8x16xf32>
    %14 = arith.truncf %13 : vector<8x16xf32> to vector<8x16xbf16>
    %15 = math.tanh %14 : vector<8x16xbf16>
    %16 = arith.extf %15 : vector<8x16xbf16> to vector<8x16xf32>
    %c0_10 = arith.constant 0 : index
    %c0_11 = arith.constant 0 : index
    %17 = vector.load %arg6[%c0_10, %c0_11] : memref<8x16xf32, #tpu.memory_space<vmem>>, vector<8x16xf32>
    tpu.vector_store %arg6[%c0_10, %c0_11], %16 {strides = array<i32>} : memref<8x16xf32, #tpu.memory_space<vmem>>, vector<8x16xf32>,
    return
  }
  func.func @transform_0(%arg0: i32) -> (i32, i32) {
    %c0_i32 = arith.constant 0 : i32
    %c0_i32_0 = arith.constant 0 : i32
    return %arg0, %c0_i32 : i32, i32
  }
  func.func @transform_1(%arg0: i32) -> (i32, i32) {
    %c0_i32 = arith.constant 0 : i32
    %c0_i32_0 = arith.constant 0 : i32
    %c0_i32_1 = arith.constant 0 : i32
    return %c0_i32, %c0_i32_0 : i32, i32
  }
  func.func @transform_2(%arg0: i32) -> (i32, i32) {
    %c0_i32 = arith.constant 0 : i32
    %c0_i32_0 = arith.constant 0 : i32
    %c0_i32_1 = arith.constant 0 : i32
    return %c0_i32, %c0_i32_0 : i32, i32
  }
  func.func @transform_3(%arg0: i32) -> (i32, i32) {
    %c0_i32 = arith.constant 0 : i32
    %c0_i32_0 = arith.constant 0 : i32
    %c0_i32_1 = arith.constant 0 : i32
    return %c0_i32, %c0_i32_0 : i32, i32
  }
  func.func @transform_4(%arg0: i32) -> (i32, i32) {
    %c0_i32 = arith.constant 0 : i32
    %c0_i32_0 = arith.constant 0 : i32
    %c0_i32_1 = arith.constant 0 : i32
    return %c0_i32, %c0_i32_0 : i32, i32
  }
  func.func @transform_5(%arg0: i32) -> (i32, i32) {
    %c0_i32 = arith.constant 0 : i32
    %c0_i32_0 = arith.constant 0 : i32
    return %arg0, %c0_i32 : i32, i32
  }
}

</mosaic_0001>

<bundles_post_ra>
// kernel: tpu_custom_call.1
= control target key start
LH: loop header
LB: loop body
LE: loop exit
PB: predicated region body
PF: predicated region fallthrough
CT: control target
= control target key end

     0   :  { %v717_v2 = vmov 0   ;;  %vm94_vm0 = vcmask 261120   ;;  %s890_s0 = inlined_call_operand.vmem [shape: f32[8,32], index: 0, kind: input, shape index: {}]   ;;  %s891_s1 = inlined_call_operand.vmem [shape: bf16[32,512], index: 1, kind: input, shape index: {}]   ;;  %s892_s2 = inlined_call_operand.vmem [shape: f32[1,512], index: 2, kind: input, shape index: {}]   ;;  %s893_s3 = inlined_call_operand.vmem [shape: bf16[512,16], index: 3, kind: input, shape index: {}]   ;;  %s894_s4 = inlined_call_operand.vmem [shape: f32[1,16], index: 4, kind: input, shape index: {}]   ;;  %s895_s5 = inlined_call_operand.hbm [shape: f32[8,16], index: 5, kind: output, shape index: {}]  }
   0x1   :  { %v639_v0 = vld [vmem:[%s891_s1 + $0x4] ss:$16 sps:$4 sm:$0xff]   ;;  %v641_v1 = vld [vmem:[%s891_s1 + $0xc] ss:$16 sps:$4 sm:$0xff]   ;;  %130 = vmatprep.mubr.bf16.mxu0 %v717_v2  ;;  %171 = vmatprep.mubr.bf16.mxu1 %v717_v2  ;;  %v643_v3 = vld [vmem:[%s891_s1] ss:$16 sps:$4 sm:$0xff]  }
   0x2   :  { %98 = vmatprep.subr.bf16.mxu0 %v639_v0  ;;  %v644_v4 = vld [vmem:[%s891_s1 + $0x8] ss:$16 sps:$4 sm:$0xff]   ;;  %139 = vmatprep.subr.bf16.mxu1 %v641_v1  ;;  %v645_v5 = vld [vmem:[%s891_s1 + $0x24] ss:$16 sps:$4 sm:$0xff]   ;;  %v647_v6 = vld [vmem:[%s891_s1 + $0x2c] ss:$16 sps:$4 sm:$0xff]  }
   0x3   :  { %99 = vmatpush1.bf16.msra.mxu0 %v643_v3  ;;  %140 = vmatpush1.bf16.msra.mxu1 %v644_v4  ;;  %v649_v7 = vld [vmem:[%s891_s1 + $0x20] ss:$16 sps:$4 sm:$0xff]   ;;  %v650_v8 = vld [vmem:[%s891_s1 + $0x28] ss:$16 sps:$4 sm:$0xff]  }
   0x4   :  { %100 = vmatprep.subr.bf16.mxu0 %v645_v5  ;;  %v22_v9 = vld [vmem:[%s890_s0] sm:$0xff]  ;;  %141 = vmatprep.subr.bf16.mxu1 %v647_v6  ;;  %v655_v15 = vld [vmem:[%s893_s3 + $0x48] sm:$0xff]   ;;  %v659_v19 = vld [vmem:[%s893_s3 + $0x50] sm:$0xff]  }
   0x5   :  { %v651_v10 = vld [vmem:[%s893_s3 + $0x40] sm:$0xff]   ;;  %v23_v11 = vpack.c.bf16 %v22_v9, %v22_v9  ;;  %v656_v16 = vld [vmem:[%s893_s3 + $0xc8] sm:$0xff]   ;;  %v660_v20 = vld [vmem:[%s893_s3 + $0xd0] sm:$0xff]  }
   0x6   :  { %v652_v12 = vld [vmem:[%s893_s3 + $0xc0] sm:$0xff]   ;;  %v657_v17 = vld [vmem:[%s893_s3 + $0x8] sm:$0xff]   ;;  %v661_v21 = vld [vmem:[%s893_s3 + $0x10] sm:$0xff]  }
   0x7   :  { %101 = vmatpush1.bf16.msra.mxu0 %v649_v7  ;;  %142 = vmatpush1.bf16.msra.mxu1 %v650_v8  ;;  %v653_v13 = vld [vmem:[%s893_s3] sm:$0xff]   ;;  %v658_v18 = vld [vmem:[%s893_s3 + $0x88] sm:$0xff]   ;;  %v662_v22 = vld [vmem:[%s893_s3 + $0x90] sm:$0xff]  }
   0x8   :  { %593 = vmatprep.subr.bf16.mxu0 %v651_v10  ;;  %615 = vmatprep.subr.bf16.mxu1 %v652_v12  ;;  %v654_v14 = vld [vmem:[%s893_s3 + $0x80] sm:$0xff]   ;;  %v663_v23 = vld [vmem:[%s893_s3 + $0x58] sm:$0xff]  }
   0x9   :  { %v664_v24 = vld [vmem:[%s893_s3 + $0xd8] sm:$0xff]  }
   0xa   :  { %558 = vmatmul.mubr.msk.bf16.vlgmr.msra.gmra.mrb[0].mxu0 %vm94_vm0, %v23_v11  ;;  %559 = vmatmul.mubr.msk.bf16.vlgmr.msra.gmra.mrb[0].mxu1 %vm94_vm0, %v23_v11 }
   0xb   :  { %594 = vmatpush3.bf16.msra.mxu0 %v653_v13  ;;  %616 = vmatpush3.bf16.msra.mxu1 %v654_v14 }
   0xc   :  { %595 = vmatprep.subr.bf16.mxu0 %v655_v15  ;;  %617 = vmatprep.subr.bf16.mxu1 %v656_v16 }
   0xf   :  { %596 = vmatpush3.bf16.msra.mxu0 %v657_v17  ;;  %618 = vmatpush3.bf16.msra.mxu1 %v658_v18 }
  0x10   :  { %597 = vmatprep.subr.bf16.mxu0 %v659_v19  ;;  %619 = vmatprep.subr.bf16.mxu1 %v660_v20 }
  0x13   :  { %598 = vmatpush3.bf16.msra.mxu0 %v661_v21  ;;  %620 = vmatpush3.bf16.msra.mxu1 %v662_v22 }
  0x14   :  { %599 = vmatprep.subr.bf16.mxu0 %v663_v23  ;;  %621 = vmatprep.subr.bf16.mxu1 %v664_v24 }
  0x15   :  { %10 = vsyncpa [#allocation3], 0  ;;  %v665_v25 = vld [vmem:[%s893_s3 + $0x18] sm:$0xff]   ;;  %v667_v27 = vld [vmem:[%s893_s3 + $0x60] sm:$0xff]   ;;  %v34_v43 = vlaneseq  ;;  %s718_s21 = smov [#allocation2]   ;;  %vm534_vm1 = vcmask 130048  }
  0x16   :  { %v666_v26 = vld [vmem:[%s893_s3 + $0x98] sm:$0xff]   ;;  %v668_v28 = vld [vmem:[%s893_s3 + $0xe0] sm:$0xff]   ;;  %v671_v31 = vld [vmem:[%s893_s3 + $0x68] sm:$0xff]   ;;  %s542_s22 = sshll.u32 %s718_s21, 4  ;;  %s543_s22 = int_to_ptr.vmem [resolvable:$true] %s542_s22 }
  0x17   :  { %600 = vmatpush3.bf16.msra.mxu0 %v665_v25  ;;  %622 = vmatpush3.bf16.msra.mxu1 %v666_v26  ;;  %v669_v29 = vld [vmem:[%s893_s3 + $0x20] sm:$0xff]   ;;  %v672_v32 = vld [vmem:[%s893_s3 + $0xe8] sm:$0xff]   ;;  %v675_v35 = vld [vmem:[%s893_s3 + $0x70] sm:$0xff]   ;;  %v35_v44 = vshrl.u32 %v34_v43, 7  ;;  %p698_p1 = scmp.lt.s32.totalorder %s543_s22, %s543_s22 }
  0x18   :  { %v670_v30 = vld [vmem:[%s893_s3 + $0xa0] sm:$0xff]   ;;  %601 = vmatprep.subr.bf16.mxu0 %v667_v27  ;;  %623 = vmatprep.subr.bf16.mxu1 %v668_v28  ;;  %v673_v33 = vld [vmem:[%s893_s3 + $0x28] sm:$0xff]   ;;  %v676_v36 = vld [vmem:[%s893_s3 + $0xf0] sm:$0xff]  }
  0x19   :  { %v674_v34 = vld [vmem:[%s893_s3 + $0xa8] sm:$0xff]   ;;  %v677_v37 = vld [vmem:[%s893_s3 + $0x30] sm:$0xff]   ;;  %v679_v39 = vld [vmem:[%s893_s3 + $0x78] sm:$0xff]   ;;  %v36_v45 = vsub.s32 0, %v35_v44  ;;  %v44_v46 = vsub.s32 2, %v35_v44  ;;  %v40_v48 = vsub.s32 1, %v35_v44 }
  0x1a   :  { %v678_v38 = vld [vmem:[%s893_s3 + $0xb0] sm:$0xff]   ;;  %v680_v40 = vld [vmem:[%s893_s3 + $0xf8] sm:$0xff]   ;;  %v32_v47 = vld [vmem:[%s892_s2] sm:$0xf]  ;;  %v48_v49 = vsub.s32 3, %v35_v44 }
  0x1b   :  { %602 = vmatpush3.bf16.msra.mxu0 %v669_v29  ;;  %624 = vmatpush3.bf16.msra.mxu1 %v670_v30  ;;  %v681_v41 = vld [vmem:[%s893_s3 + $0x38] sm:$0xff]   ;;  %v37_v50 = vrot.slane %v32_v47, %v36_v45  ;;  %v45_v51 = vrot.slane %v32_v47, %v44_v46  ;;  %v41_v52 = vrot.slane %v32_v47, %v40_v48  ;;  %v560_v12 = vld [vmem:[%s894_s4] ss:$0 sm:$0xff]  ;;  %s693_s4 = scalar_lea.vmem %s543_s22, 128 }
  0x1c   :  { %603 = vmatprep.subr.bf16.mxu0 %v671_v31  ;;  %625 = vmatprep.subr.bf16.mxu1 %v672_v32  ;;  %v682_v42 = vld [vmem:[%s893_s3 + $0xb8] sm:$0xff]   ;;  %v49_v53 = vrot.slane %v32_v47, %v48_v49  ;;  %p694_p0 = scmp.ne.s32.totalorder %s543_s22, %s693_s4  ;;  %p699_p2 = scmp.lt.s32.totalorder %s693_s4, %s693_s4 }
  0x1e   :  { %p700_p3 = por %p699_p2, %p698_p1 }
  0x1f   :  { %604 = vmatpush3.bf16.msra.mxu0 %v673_v33  ;;  %626 = vmatpush3.bf16.msra.mxu1 %v674_v34 }
  0x20   :  { %605 = vmatprep.subr.bf16.mxu0 %v675_v35  ;;  %627 = vmatprep.subr.bf16.mxu1 %v676_v36  ;;  %p701_p4 = pnand %p700_p3, %p694_p0 }
  0x23   :  { %606 = vmatpush3.bf16.msra.mxu0 %v677_v37  ;;  %628 = vmatpush3.bf16.msra.mxu1 %v678_v38 }
  0x24   :  { %607 = vmatprep.subr.bf16.mxu0 %v679_v39  ;;  %629 = vmatprep.subr.bf16.mxu1 %v680_v40 }
  0x27   :  { %608 = vmatpush3.bf16.msra.mxu0 %v681_v41  ;;  %630 = vmatpush3.bf16.msra.mxu1 %v682_v42 }
  0xdd   :  { %v132_v54 = vpop.f32.mrb[0].mxu0  ;;  %v173_v55 = vpop.f32.mrb[0].mxu1 }
  0xde   :  { %v133_v56 = vadd.f32 %v132_v54, %v37_v50  ;;  %v174_v57 = vadd.f32 %v173_v55, %v45_v51  ;;  %v134_v58 = vpop.f32.mrb[1].mxu0  ;;  %v175_v59 = vpop.f32.mrb[1].mxu1 }
  0xdf   :  { %v135_v60 = vadd.f32 %v134_v58, %v41_v52  ;;  %v176_v61 = vadd.f32 %v175_v59, %v49_v53  ;;  %v136_v62 = vpop.f32.mrb[2].mxu0  ;;  %v177_v63 = vpop.f32.mrb[2].mxu1 }
  0xe0   :  { %v180_v0 = vpack.c.bf16 %v133_v56, %v133_v56  ;;  %v182_v1 = vpack.c.bf16 %v174_v57, %v174_v57  ;;  %v137_v2 = vpop.f32.mrb[3].mxu0  ;;  %v178_v3 = vpop.f32.mrb[3].mxu1 }
  0xe1   :  { %v181_v4 = vpack.c.bf16 %v135_v60, %v135_v60  ;;  %v183_v5 = vpack.c.bf16 %v176_v61, %v176_v61 }
  0xe2   :  { %683 = vtanh.bf16 %v180_v0 }
  0xe3   :  { %685 = vtanh.bf16 %v182_v1 }
  0xe4   :  { %687 = vtanh.bf16 %v181_v4 }
  0xe5   :  { %689 = vtanh.bf16 %v183_v5 }
  0xed   :  { %v684_v6 = vpop.eup %683 }
  0xee   :  { %v686_v7 = vpop.eup %685 }
  0xef   :  { %v688_v8 = vpop.eup %687 }
  0xf0   :  { %v690_v9 = vpop.eup %689  ;;  %483 = vmatprep.mubr.bf16.mxu0 %v688_v8 }
  0xf1   :  { %523 = vmatprep.mubr.bf16.mxu1 %v690_v9  ;;  %484 = vmatmul.mubr.bf16.vlgmr.msra.gmra.mrb[4].mxu0 %v684_v6 }
  0xf2   :  { %524 = vmatmul.mubr.bf16.vlgmr.msra.gmra.mrb[4].mxu1 %v686_v7 }
 0x1c4   :  { %v609_v10 = vpop.f32.mrb[4].mxu0 }
 0x1c5   :  { %v631_v11 = vpop.f32.mrb[4].mxu1  ;;  %v610_v13 = vpop.f32.mrb[5].mxu0 }
 0x1c6   :  { %v611_v14 = vadd.f32 %v610_v13, %v609_v10  ;;  %v632_v15 = vpop.f32.mrb[5].mxu1  ;;  %v612_v16 = vpop.f32.mrb[6].mxu0 }
 0x1c7   :  { %v633_v17 = vadd.f32 %v632_v15, %v631_v11  ;;  %v634_v18 = vpop.f32.mrb[6].mxu1  ;;  %v613_v19 = vpop.f32.mrb[7].mxu0 }
 0x1c8   :  { %v486_v20 = vadd.f32 %v611_v14, %v560_v12  ;;  %v635_v21 = vpop.f32.mrb[7].mxu1 }
 0x1ca   :  { %v526_v22 = vadd.f32 %v633_v17, %v486_v20 }
 0x1cc   :  { %v531_v23 = vpack.c.bf16 %v526_v22, %v526_v22 }
 0x1ce   :  { %691 = vtanh.bf16 %v531_v23 }
 0x1d9   :  { %v692_v24 = vpop.eup %691 }
 0x1da   :  { %v533_v25 = vunpack.c.l.bf16 %v692_v24 }
 0x1dc   :  { %535 = vst.msk [vmem:[#allocation2] sm:$0xff] %vm534_vm1, %v533_v25 }
 0x1dd   :  { %704 = shalt.err (!%p701_p4)
}
 0x1de   :  { %s705_s25 = scalar_lea.hbm %s895_s5, 128 }
 0x1df   :  { %p706_p5 = scmp.ne.s32.totalorder %s895_s5, %s705_s25  ;;  %p709_p6 = scmp.lt.u32.totalorder %s705_s25, %s895_s5 }
 0x1e1   :  { %p711_p7 = pnand %p709_p6, %p706_p5 }
 0x1e3   :  { %714 = shalt.err (!%p711_p7)
}
 0x1e4   :  { %545 = dma.vmem_to_hbm [thread:$0]  %s543_s22, 128, %s895_s5, [#allocation3]  }
 0x1e5   :  { %715 = dma.done.wait [#allocation3], 128  }
 0x1e6   :  { %716 = vsyncadd [#allocation3], 4294967168 }
 0x1e7   :  { %549 = vsyncpa [#allocation3], 1 }

</bundles_post_ra>
